<compile_context>
chip_gen: v6e
topology: v6e:2x2x1
jax: 0.10.0
libtpu: 0.0.40
codegen_flags: <defaults>
</compile_context>

<pallas_src>
import math
import random

import jax
import jax.numpy as jnp
from jax.experimental import pallas as pl
from jax.experimental.pallas import tpu as pltpu

LAYER_NUM = 5
ACTS = ["ReLU", "Sigmoid", "SoftMax", "ELU"]
LANE_PAD = 128  # keep fp == 128: native v5e MXU tile, lane-dense on all generations


def _skip_sources(skip_from):
    """Layers whose output is consumed by a later layer's skip connection."""
    return sorted({j for srcs in skip_from for j in srcs})


def _make_layer_step_kernel(acts, skip_from, f_valid, num_layers):
    """One grid step == one GCN layer. Static per-layer code selected via pl.when."""
    slot = {j: k for k, j in enumerate(_skip_sources(skip_from))}

    def kernel(x_ref, adj_ref, w_ref, b_ref, o_ref, skip_ref, cur_ref):
        l = pl.program_id(0)
        n, fp = x_ref.shape

        for i in range(num_layers):

            @pl.when(l == i)
            def _(i=i):
                # --- GCN.get_merged_x / kernel(): ReLU of summed inputs (chain + skips)
                x_in = x_ref[...] if i == 0 else cur_ref[...]
                for j in skip_from[i]:
                    x_in = x_in + skip_ref[slot[j]]
                merged = jnp.maximum(x_in, 0.0)

                # --- GraphConvolution: adj @ (merged @ W) + b  (bf16 MXU, f32 accumulate)
                support = jnp.dot(merged.astype(jnp.bfloat16), w_ref[0],
                                  preferred_element_type=jnp.float32)
                out = jnp.dot(adj_ref[...], support.astype(jnp.bfloat16),
                              preferred_element_type=jnp.float32)
                out = out + b_ref[0]

                # --- activation (static choice per layer)
                act = acts[i]
                if act == "ReLU":
                    out = jnp.maximum(out, 0.0)
                elif act == "Sigmoid":
                    # numerically stable sigmoid; reciprocal on the EUP slot
                    z = jnp.exp(-jnp.abs(out))
                    inv = pl.reciprocal(1.0 + z, approx=True)
                    out = jnp.where(out >= 0.0, inv, z * inv)
                    # only Sigmoid turns the zero padded lanes nonzero -> re-zero them
                    col = jax.lax.broadcasted_iota(jnp.int32, (n, fp), 1)
                    out = jnp.where(col < f_valid, out, 0.0)
                elif act == "SoftMax":  # F.softmax(x, dim=1) over the valid feature cols
                    col = jax.lax.broadcasted_iota(jnp.int32, (n, fp), 1)
                    valid = col < f_valid
                    m = jnp.max(jnp.where(valid, out, -jnp.inf), axis=1, keepdims=True)
                    e = jnp.where(valid, jnp.exp(out - m), 0.0)
                    out = e / jnp.sum(e, axis=1, keepdims=True)  # exact recip for accuracy
                elif act == "ELU":
                    # clamp dead branch so exp never sees large positives
                    out = jnp.where(out > 0.0, out,
                                    jnp.exp(jnp.minimum(out, 0.0)) - 1.0)
                else:
                    raise ValueError(f"unknown activation {act}")

                # dropout: identity in eval mode

                if i in slot:              # a later layer skip-reads this output
                    skip_ref[slot[i]] = out
                if i < num_layers - 1:     # carry chain to the next layer step
                    cur_ref[...] = out
                else:                      # final layer -> kernel output
                    o_ref[...] = out.astype(o_ref.dtype)

    return kernel


def _build_forward(acts, skip_from, f_valid, fp):
    """Returns a jit-cached forward(x, adj, w_stack, b_stack) -> (N, F) array."""
    num_layers = len(acts)
    n_skip_slots = max(1, len(_skip_sources(skip_from)))
    kernel = _make_layer_step_kernel(acts, skip_from, f_valid, num_layers)

    def forward(x, adj, w_stack, b_stack):
        n, f = x.shape
        x_p = jnp.pad(x, ((0, 0), (0, fp - f)))
        adj_bf = adj.astype(jnp.bfloat16)  # deliberate bf16 adjacency (documented tradeoff)

        out_p = pl.pallas_call(
            kernel,
            out_shape=jax.ShapeDtypeStruct((n, fp), jnp.float32),
            grid=(num_layers,),
            in_specs=[
                pl.BlockSpec((n, fp), lambda l: (0, 0)),                 # x (resident)
                pl.BlockSpec((n, n), lambda l: (0, 0)),                  # adj (resident, bf16)
                pl.BlockSpec((1, fp, fp), lambda l: (l, 0, 0)),          # per-layer W (prefetched)
                pl.BlockSpec((1, 1, fp), lambda l: (l, 0, 0)),           # per-layer b
            ],
            out_specs=pl.BlockSpec((n, fp), lambda l: (0, 0)),           # resident across layers
            scratch_shapes=[
                pltpu.VMEM((n_skip_slots, n, fp), jnp.float32),          # skip-source outputs
                pltpu.VMEM((n, fp), jnp.float32),                        # layer->layer chain
            ],
            compiler_params=pltpu.CompilerParams(
                dimension_semantics=("arbitrary",),                      # sequential layer dep
            ),
        )(x_p, adj_bf, w_stack, b_stack)

        return out_p[:, :f]

    return jax.jit(forward)


class GCNPallas:
    """JAX/Pallas port of the PyTorch GCN module (structure built deterministically)."""

    def __init__(self, n_feat, dropout, key):
        self.dropout = dropout  # F.dropout with training=False -> identity in this port

        # GraphConvolution.reset_parameters(): uniform(-stdv, stdv), stdv = 1/sqrt(out_features)
        stdv = 1.0 / math.sqrt(n_feat)
        keys = jax.random.split(key, 2 * LAYER_NUM)
        self.weights = [
            jax.random.uniform(keys[2 * i], (n_feat, n_feat), jnp.float32, -stdv, stdv)
            for i in range(LAYER_NUM)
        ]
        self.biases = [
            jax.random.uniform(keys[2 * i + 1], (n_feat,), jnp.float32, -stdv, stdv)
            for i in range(LAYER_NUM)
        ]

        # build_structure() — deterministic via seeded Python RNG (host side; static structure)
        random.seed(0)
        self.skip_to = []
        self.ac_func = []
        for i in range(LAYER_NUM):
            self.skip_to.append(self._random_select_skip_to_layers(i))
            self.ac_func.append(random.choice(ACTS))

        # invert skip_to -> skip_from (which earlier outputs feed layer i)
        self.skip_from = [
            [j for j in range(i) if i in self.skip_to[j]] for i in range(LAYER_NUM)
        ]

        # ---- hoisted per-call input prep (done ONCE, not per forward) ----
        fp = ((max(n_feat, LANE_PAD) + LANE_PAD - 1) // LANE_PAD) * LANE_PAD
        pad = fp - n_feat
        self.fp = fp
        self.w_stack = jnp.stack(
            [jnp.pad(w, ((0, pad), (0, pad))) for w in self.weights]
        ).astype(jnp.bfloat16)                                        # (L, fp, fp) bf16
        self.b_stack = jnp.stack(
            [jnp.pad(b, (0, pad)).reshape(1, fp) for b in self.biases]
        ).astype(jnp.float32)                                         # (L, 1, fp)  f32

        self._forward = _build_forward(
            tuple(self.ac_func),
            tuple(tuple(s) for s in self.skip_from),
            n_feat,
            fp,
        )

    @staticmethod
    def _random_select_skip_to_layers(i):
        hi = LAYER_NUM - i - 2 if i < LAYER_NUM - 2 else 0
        return random.sample(range(i + 2, LAYER_NUM), random.randint(0, hi))

    def __call__(self, x, adj):
        return self._forward(x, adj, self.w_stack, self.b_stack)


if __name__ == "__main__":
    N_NODES = 16
    N_FEAT = 32

    key = jax.random.PRNGKey(0)
    k_x, k_adj, k_params = jax.random.split(key, 3)

    # Node features
    x = jax.random.normal(k_x, (N_NODES, N_FEAT), dtype=jnp.float32)

    # Symmetric, self-loop-added, row-normalized dense adjacency
    a = (jax.random.uniform(k_adj, (N_NODES, N_NODES)) > 0.7).astype(jnp.float32)
    a = jnp.maximum(a, a.T) + jnp.eye(N_NODES, dtype=jnp.float32)
    adj = a / jnp.sum(a, axis=1, keepdims=True)

    model = GCNPallas(N_FEAT, dropout=0.5, key=k_params)
    out = model(x, adj)
    out = jax.block_until_ready(out)

    assert out.shape == (N_NODES, N_FEAT)
    assert bool(jnp.all(jnp.isfinite(out)))
    print("KERNEL_OK")
</pallas_src>

<mosaic_0001>
module attributes {stable_mosaic.version = 11 : i64} {
  func.func @kernel(%arg0: i32, %arg1: memref<16x128xf32, #tpu.memory_space<vmem>>, %arg2: memref<16x16xbf16, #tpu.memory_space<vmem>>, %arg3: memref<1x128x128xbf16, #tpu.memory_space<vmem>>, %arg4: memref<1x1x128xf32, #tpu.memory_space<vmem>>, %arg5: memref<16x128xf32, #tpu.memory_space<vmem>>, %arg6: memref<3x16x128xf32, #tpu.memory_space<vmem>>, %arg7: memref<16x128xf32, #tpu.memory_space<vmem>>) attributes {dimension_semantics = [#tpu.dimension_semantics<arbitrary>], iteration_bounds = array<i64: 5>, scalar_prefetch = 0 : i64, scratch_operands = 2 : i64, tpu.core_type = #tpu.core_type<tc>, window_params = [{pipeline_mode = #tpu.pipeline_mode<synchronous>, transform_indices = @transform_0, window_bounds = array<i64: 16, 128>}, {pipeline_mode = #tpu.pipeline_mode<synchronous>, transform_indices = @transform_1, window_bounds = array<i64: 16, 16>}, {transform_indices = @transform_2, window_bounds = array<i64: 1, 128, 128>}, {transform_indices = @transform_3, window_bounds = array<i64: 1, 1, 128>}, {pipeline_mode = #tpu.pipeline_mode<synchronous>, transform_indices = @transform_4, window_bounds = array<i64: 16, 128>}]} {
    %c0_i32 = arith.constant 0 : i32
    %0 = arith.cmpi eq, %arg0, %c0_i32 : i32
    %1 = arith.extui %0 : i1 to i32
    %c0_i32_0 = arith.constant 0 : i32
    %2 = arith.cmpi ne, %1, %c0_i32_0 : i32
    scf.if %2 {
      %c0 = arith.constant 0 : index
      %c0_5 = arith.constant 0 : index
      %15 = vector.load %arg1[%c0, %c0_5] : memref<16x128xf32, #tpu.memory_space<vmem>>, vector<16x128xf32>
      %cst = arith.constant 0.000000e+00 : f32
      %16 = vector.broadcast %cst : f32 to vector<16x128xf32>
      %17 = arith.maximumf %15, %16 : vector<16x128xf32>
      %18 = arith.truncf %17 : vector<16x128xf32> to vector<16x128xbf16>
      %c0_6 = arith.constant 0 : index
      %c0_7 = arith.constant 0 : index
      %c0_8 = arith.constant 0 : index
      %19 = vector.load %arg3[%c0_6, %c0_7, %c0_8] : memref<1x128x128xbf16, #tpu.memory_space<vmem>>, vector<1x128x128xbf16>
      %20 = vector.shape_cast %19 : vector<1x128x128xbf16> to vector<128x128xbf16>
      %cst_9 = arith.constant dense<0.000000e+00> : vector<16x128xf32>
      %21 = tpu.matmul %18, %20, %cst_9 {dimension_numbers = #tpu.dot_dimension_numbers<[1], [0], [0], [1], [0, 0, 1, 1], [], []>} : vector<16x128xbf16>, vector<128x128xbf16>, vector<16x128xf32> -> vector<16x128xf32>
      %c0_10 = arith.constant 0 : index
      %c0_11 = arith.constant 0 : index
      %22 = vector.load %arg2[%c0_10, %c0_11] : memref<16x16xbf16, #tpu.memory_space<vmem>>, vector<16x16xbf16>
      %23 = arith.truncf %21 : vector<16x128xf32> to vector<16x128xbf16>
      %cst_12 = arith.constant dense<0.000000e+00> : vector<16x128xf32>
      %24 = tpu.matmul %22, %23, %cst_12 {dimension_numbers = #tpu.dot_dimension_numbers<[1], [0], [0], [1], [0, 0, 1, 1], [], []>} : vector<16x16xbf16>, vector<16x128xbf16>, vector<16x128xf32> -> vector<16x128xf32>
      %c0_13 = arith.constant 0 : index
      %c0_14 = arith.constant 0 : index
      %c0_15 = arith.constant 0 : index
      %25 = vector.load %arg4[%c0_13, %c0_14, %c0_15] : memref<1x1x128xf32, #tpu.memory_space<vmem>>, vector<1x1x128xf32>
      %26 = vector.shape_cast %25 : vector<1x1x128xf32> to vector<1x128xf32>
      %27 = vector.broadcast %26 : vector<1x128xf32> to vector<16x128xf32>
      %28 = arith.addf %24, %27 : vector<16x128xf32>
      %cst_16 = arith.constant 0.000000e+00 : f32
      %29 = vector.broadcast %cst_16 : f32 to vector<16x128xf32>
      %30 = arith.cmpf ogt, %28, %29 : vector<16x128xf32>
      %cst_17 = arith.constant 0.000000e+00 : f32
      %31 = vector.broadcast %cst_17 : f32 to vector<16x128xf32>
      %32 = arith.minimumf %28, %31 : vector<16x128xf32>
      %33 = math.exp %32 : vector<16x128xf32>
      %cst_18 = arith.constant 1.000000e+00 : f32
      %34 = vector.broadcast %cst_18 : f32 to vector<16x128xf32>
      %35 = arith.subf %33, %34 : vector<16x128xf32>
      %36 = arith.select %30, %28, %35 : vector<16x128xi1>, vector<16x128xf32>
      %c0_19 = arith.constant 0 : index
      %c0_20 = arith.constant 0 : index
      %c0_21 = arith.constant 0 : index
      %37 = vector.load %arg6[%c0_19, %c0_20, %c0_21] : memref<3x16x128xf32, #tpu.memory_space<vmem>>, vector<1x16x128xf32>
      %38 = vector.shape_cast %37 : vector<1x16x128xf32> to vector<16x128xf32>
      %39 = vector.shape_cast %36 : vector<16x128xf32> to vector<1x16x128xf32>
      tpu.vector_store %arg6[%c0_19, %c0_20, %c0_21], %39 {strides = array<i32>} : memref<3x16x128xf32, #tpu.memory_space<vmem>>, vector<1x16x128xf32>,
      %c0_22 = arith.constant 0 : index
      %c0_23 = arith.constant 0 : index
      %40 = vector.load %arg7[%c0_22, %c0_23] : memref<16x128xf32, #tpu.memory_space<vmem>>, vector<16x128xf32>
      tpu.vector_store %arg7[%c0_22, %c0_23], %36 {strides = array<i32>} : memref<16x128xf32, #tpu.memory_space<vmem>>, vector<16x128xf32>,
    } else {
    }
    %c1_i32 = arith.constant 1 : i32
    %3 = arith.cmpi eq, %arg0, %c1_i32 : i32
    %4 = arith.extui %3 : i1 to i32
    %c0_i32_1 = arith.constant 0 : i32
    %5 = arith.cmpi ne, %4, %c0_i32_1 : i32
    scf.if %5 {
      %c0 = arith.constant 0 : index
      %c0_5 = arith.constant 0 : index
      %15 = vector.load %arg7[%c0, %c0_5] : memref<16x128xf32, #tpu.memory_space<vmem>>, vector<16x128xf32>
      %cst = arith.constant 0.000000e+00 : f32
      %16 = vector.broadcast %cst : f32 to vector<16x128xf32>
      %17 = arith.maximumf %15, %16 : vector<16x128xf32>
      %18 = arith.truncf %17 : vector<16x128xf32> to vector<16x128xbf16>
      %c0_6 = arith.constant 0 : index
      %c0_7 = arith.constant 0 : index
      %c0_8 = arith.constant 0 : index
      %19 = vector.load %arg3[%c0_6, %c0_7, %c0_8] : memref<1x128x128xbf16, #tpu.memory_space<vmem>>, vector<1x128x128xbf16>
      %20 = vector.shape_cast %19 : vector<1x128x128xbf16> to vector<128x128xbf16>
      %cst_9 = arith.constant dense<0.000000e+00> : vector<16x128xf32>
      %21 = tpu.matmul %18, %20, %cst_9 {dimension_numbers = #tpu.dot_dimension_numbers<[1], [0], [0], [1], [0, 0, 1, 1], [], []>} : vector<16x128xbf16>, vector<128x128xbf16>, vector<16x128xf32> -> vector<16x128xf32>
      %c0_10 = arith.constant 0 : index
      %c0_11 = arith.constant 0 : index
      %22 = vector.load %arg2[%c0_10, %c0_11] : memref<16x16xbf16, #tpu.memory_space<vmem>>, vector<16x16xbf16>
      %23 = arith.truncf %21 : vector<16x128xf32> to vector<16x128xbf16>
      %cst_12 = arith.constant dense<0.000000e+00> : vector<16x128xf32>
      %24 = tpu.matmul %22, %23, %cst_12 {dimension_numbers = #tpu.dot_dimension_numbers<[1], [0], [0], [1], [0, 0, 1, 1], [], []>} : vector<16x16xbf16>, vector<16x128xbf16>, vector<16x128xf32> -> vector<16x128xf32>
      %c0_13 = arith.constant 0 : index
      %c0_14 = arith.constant 0 : index
      %c0_15 = arith.constant 0 : index
      %25 = vector.load %arg4[%c0_13, %c0_14, %c0_15] : memref<1x1x128xf32, #tpu.memory_space<vmem>>, vector<1x1x128xf32>
      %26 = vector.shape_cast %25 : vector<1x1x128xf32> to vector<1x128xf32>
      %27 = vector.broadcast %26 : vector<1x128xf32> to vector<16x128xf32>
      %28 = arith.addf %24, %27 : vector<16x128xf32>
      %cst_16 = arith.constant 0.000000e+00 : f32
      %29 = vector.broadcast %cst_16 : f32 to vector<16x128xf32>
      %30 = arith.cmpf ogt, %28, %29 : vector<16x128xf32>
      %cst_17 = arith.constant 0.000000e+00 : f32
      %31 = vector.broadcast %cst_17 : f32 to vector<16x128xf32>
      %32 = arith.minimumf %28, %31 : vector<16x128xf32>
      %33 = math.exp %32 : vector<16x128xf32>
      %cst_18 = arith.constant 1.000000e+00 : f32
      %34 = vector.broadcast %cst_18 : f32 to vector<16x128xf32>
      %35 = arith.subf %33, %34 : vector<16x128xf32>
      %36 = arith.select %30, %28, %35 : vector<16x128xi1>, vector<16x128xf32>
      %c1 = arith.constant 1 : index
      %c0_19 = arith.constant 0 : index
      %c0_20 = arith.constant 0 : index
      %37 = vector.load %arg6[%c1, %c0_19, %c0_20] : memref<3x16x128xf32, #tpu.memory_space<vmem>>, vector<1x16x128xf32>
      %38 = vector.shape_cast %37 : vector<1x16x128xf32> to vector<16x128xf32>
      %39 = vector.shape_cast %36 : vector<16x128xf32> to vector<1x16x128xf32>
      tpu.vector_store %arg6[%c1, %c0_19, %c0_20], %39 {strides = array<i32>} : memref<3x16x128xf32, #tpu.memory_space<vmem>>, vector<1x16x128xf32>,
      %c0_21 = arith.constant 0 : index
      %c0_22 = arith.constant 0 : index
      %40 = vector.load %arg7[%c0_21, %c0_22] : memref<16x128xf32, #tpu.memory_space<vmem>>, vector<16x128xf32>
      tpu.vector_store %arg7[%c0_21, %c0_22], %36 {strides = array<i32>} : memref<16x128xf32, #tpu.memory_space<vmem>>, vector<16x128xf32>,
    } else {
    }
    %c2_i32 = arith.constant 2 : i32
    %6 = arith.cmpi eq, %arg0, %c2_i32 : i32
    %7 = arith.extui %6 : i1 to i32
    %c0_i32_2 = arith.constant 0 : i32
    %8 = arith.cmpi ne, %7, %c0_i32_2 : i32
    scf.if %8 {
      %c0 = arith.constant 0 : index
      %c0_5 = arith.constant 0 : index
      %15 = vector.load %arg7[%c0, %c0_5] : memref<16x128xf32, #tpu.memory_space<vmem>>, vector<16x128xf32>
      %c0_6 = arith.constant 0 : index
      %c0_7 = arith.constant 0 : index
      %c0_8 = arith.constant 0 : index
      %16 = vector.load %arg6[%c0_6, %c0_7, %c0_8] : memref<3x16x128xf32, #tpu.memory_space<vmem>>, vector<1x16x128xf32>
      %17 = vector.shape_cast %16 : vector<1x16x128xf32> to vector<16x128xf32>
      %18 = arith.addf %15, %17 : vector<16x128xf32>
      %cst = arith.constant 0.000000e+00 : f32
      %19 = vector.broadcast %cst : f32 to vector<16x128xf32>
      %20 = arith.maximumf %18, %19 : vector<16x128xf32>
      %21 = arith.truncf %20 : vector<16x128xf32> to vector<16x128xbf16>
      %c0_9 = arith.constant 0 : index
      %c0_10 = arith.constant 0 : index
      %c0_11 = arith.constant 0 : index
      %22 = vector.load %arg3[%c0_9, %c0_10, %c0_11] : memref<1x128x128xbf16, #tpu.memory_space<vmem>>, vector<1x128x128xbf16>
      %23 = vector.shape_cast %22 : vector<1x128x128xbf16> to vector<128x128xbf16>
      %cst_12 = arith.constant dense<0.000000e+00> : vector<16x128xf32>
      %24 = tpu.matmul %21, %23, %cst_12 {dimension_numbers = #tpu.dot_dimension_numbers<[1], [0], [0], [1], [0, 0, 1, 1], [], []>} : vector<16x128xbf16>, vector<128x128xbf16>, vector<16x128xf32> -> vector<16x128xf32>
      %c0_13 = arith.constant 0 : index
      %c0_14 = arith.constant 0 : index
      %25 = vector.load %arg2[%c0_13, %c0_14] : memref<16x16xbf16, #tpu.memory_space<vmem>>, vector<16x16xbf16>
      %26 = arith.truncf %24 : vector<16x128xf32> to vector<16x128xbf16>
      %cst_15 = arith.constant dense<0.000000e+00> : vector<16x128xf32>
      %27 = tpu.matmul %25, %26, %cst_15 {dimension_numbers = #tpu.dot_dimension_numbers<[1], [0], [0], [1], [0, 0, 1, 1], [], []>} : vector<16x16xbf16>, vector<16x128xbf16>, vector<16x128xf32> -> vector<16x128xf32>
      %c0_16 = arith.constant 0 : index
      %c0_17 = arith.constant 0 : index
      %c0_18 = arith.constant 0 : index
      %28 = vector.load %arg4[%c0_16, %c0_17, %c0_18] : memref<1x1x128xf32, #tpu.memory_space<vmem>>, vector<1x1x128xf32>
      %29 = vector.shape_cast %28 : vector<1x1x128xf32> to vector<1x128xf32>
      %30 = vector.broadcast %29 : vector<1x128xf32> to vector<16x128xf32>
      %31 = arith.addf %27, %30 : vector<16x128xf32>
      %32 = math.absf %31 : vector<16x128xf32>
      %cst_19 = arith.constant 0.000000e+00 : f32
      %33 = vector.broadcast %cst_19 : f32 to vector<16x128xf32>
      %34 = arith.subf %33, %32 : vector<16x128xf32>
      %35 = math.exp %34 : vector<16x128xf32>
      %cst_20 = arith.constant 1.000000e+00 : f32
      %36 = vector.broadcast %cst_20 : f32 to vector<16x128xf32>
      %37 = arith.addf %36, %35 : vector<16x128xf32>
      %38 = tpu.reciprocal %37 {approx = true} : vector<16x128xf32> -> vector<16x128xf32>
      %cst_21 = arith.constant 0.000000e+00 : f32
      %39 = vector.broadcast %cst_21 : f32 to vector<16x128xf32>
      %40 = arith.cmpf oge, %31, %39 : vector<16x128xf32>
      %41 = arith.mulf %35, %38 : vector<16x128xf32>
      %42 = arith.select %40, %38, %41 : vector<16x128xi1>, vector<16x128xf32>
      %43 = tpu.iota {dimensions = array<i32: 1>} : vector<16x128xi32>
      %c32_i32 = arith.constant 32 : i32
      %44 = vector.broadcast %c32_i32 : i32 to vector<16x128xi32>
      %45 = arith.cmpi slt, %43, %44 : vector<16x128xi32>
      %cst_22 = arith.constant 0.000000e+00 : f32
      %46 = vector.broadcast %cst_22 : f32 to vector<16x128xf32>
      %47 = arith.select %45, %42, %46 : vector<16x128xi1>, vector<16x128xf32>
      %c2 = arith.constant 2 : index
      %c0_23 = arith.constant 0 : index
      %c0_24 = arith.constant 0 : index
      %48 = vector.load %arg6[%c2, %c0_23, %c0_24] : memref<3x16x128xf32, #tpu.memory_space<vmem>>, vector<1x16x128xf32>
      %49 = vector.shape_cast %48 : vector<1x16x128xf32> to vector<16x128xf32>
      %50 = vector.shape_cast %47 : vector<16x128xf32> to vector<1x16x128xf32>
      tpu.vector_store %arg6[%c2, %c0_23, %c0_24], %50 {strides = array<i32>} : memref<3x16x128xf32, #tpu.memory_space<vmem>>, vector<1x16x128xf32>,
      %c0_25 = arith.constant 0 : index
      %c0_26 = arith.constant 0 : index
      %51 = vector.load %arg7[%c0_25, %c0_26] : memref<16x128xf32, #tpu.memory_space<vmem>>, vector<16x128xf32>
      tpu.vector_store %arg7[%c0_25, %c0_26], %47 {strides = array<i32>} : memref<16x128xf32, #tpu.memory_space<vmem>>, vector<16x128xf32>,
    } else {
    }
    %c3_i32 = arith.constant 3 : i32
    %9 = arith.cmpi eq, %arg0, %c3_i32 : i32
    %10 = arith.extui %9 : i1 to i32
    %c0_i32_3 = arith.constant 0 : i32
    %11 = arith.cmpi ne, %10, %c0_i32_3 : i32
    scf.if %11 {
      %c0 = arith.constant 0 : index
      %c0_5 = arith.constant 0 : index
      %15 = vector.load %arg7[%c0, %c0_5] : memref<16x128xf32, #tpu.memory_space<vmem>>, vector<16x128xf32>
      %c0_6 = arith.constant 0 : index
      %c0_7 = arith.constant 0 : index
      %c0_8 = arith.constant 0 : index
      %16 = vector.load %arg6[%c0_6, %c0_7, %c0_8] : memref<3x16x128xf32, #tpu.memory_space<vmem>>, vector<1x16x128xf32>
      %17 = vector.shape_cast %16 : vector<1x16x128xf32> to vector<16x128xf32>
      %18 = arith.addf %15, %17 : vector<16x128xf32>
      %cst = arith.constant 0.000000e+00 : f32
      %19 = vector.broadcast %cst : f32 to vector<16x128xf32>
      %20 = arith.maximumf %18, %19 : vector<16x128xf32>
      %21 = arith.truncf %20 : vector<16x128xf32> to vector<16x128xbf16>
      %c0_9 = arith.constant 0 : index
      %c0_10 = arith.constant 0 : index
      %c0_11 = arith.constant 0 : index
      %22 = vector.load %arg3[%c0_9, %c0_10, %c0_11] : memref<1x128x128xbf16, #tpu.memory_space<vmem>>, vector<1x128x128xbf16>
      %23 = vector.shape_cast %22 : vector<1x128x128xbf16> to vector<128x128xbf16>
      %cst_12 = arith.constant dense<0.000000e+00> : vector<16x128xf32>
      %24 = tpu.matmul %21, %23, %cst_12 {dimension_numbers = #tpu.dot_dimension_numbers<[1], [0], [0], [1], [0, 0, 1, 1], [], []>} : vector<16x128xbf16>, vector<128x128xbf16>, vector<16x128xf32> -> vector<16x128xf32>
      %c0_13 = arith.constant 0 : index
      %c0_14 = arith.constant 0 : index
      %25 = vector.load %arg2[%c0_13, %c0_14] : memref<16x16xbf16, #tpu.memory_space<vmem>>, vector<16x16xbf16>
      %26 = arith.truncf %24 : vector<16x128xf32> to vector<16x128xbf16>
      %cst_15 = arith.constant dense<0.000000e+00> : vector<16x128xf32>
      %27 = tpu.matmul %25, %26, %cst_15 {dimension_numbers = #tpu.dot_dimension_numbers<[1], [0], [0], [1], [0, 0, 1, 1], [], []>} : vector<16x16xbf16>, vector<16x128xbf16>, vector<16x128xf32> -> vector<16x128xf32>
      %c0_16 = arith.constant 0 : index
      %c0_17 = arith.constant 0 : index
      %c0_18 = arith.constant 0 : index
      %28 = vector.load %arg4[%c0_16, %c0_17, %c0_18] : memref<1x1x128xf32, #tpu.memory_space<vmem>>, vector<1x1x128xf32>
      %29 = vector.shape_cast %28 : vector<1x1x128xf32> to vector<1x128xf32>
      %30 = vector.broadcast %29 : vector<1x128xf32> to vector<16x128xf32>
      %31 = arith.addf %27, %30 : vector<16x128xf32>
      %32 = math.absf %31 : vector<16x128xf32>
      %cst_19 = arith.constant 0.000000e+00 : f32
      %33 = vector.broadcast %cst_19 : f32 to vector<16x128xf32>
      %34 = arith.subf %33, %32 : vector<16x128xf32>
      %35 = math.exp %34 : vector<16x128xf32>
      %cst_20 = arith.constant 1.000000e+00 : f32
      %36 = vector.broadcast %cst_20 : f32 to vector<16x128xf32>
      %37 = arith.addf %36, %35 : vector<16x128xf32>
      %38 = tpu.reciprocal %37 {approx = true} : vector<16x128xf32> -> vector<16x128xf32>
      %cst_21 = arith.constant 0.000000e+00 : f32
      %39 = vector.broadcast %cst_21 : f32 to vector<16x128xf32>
      %40 = arith.cmpf oge, %31, %39 : vector<16x128xf32>
      %41 = arith.mulf %35, %38 : vector<16x128xf32>
      %42 = arith.select %40, %38, %41 : vector<16x128xi1>, vector<16x128xf32>
      %43 = tpu.iota {dimensions = array<i32: 1>} : vector<16x128xi32>
      %c32_i32 = arith.constant 32 : i32
      %44 = vector.broadcast %c32_i32 : i32 to vector<16x128xi32>
      %45 = arith.cmpi slt, %43, %44 : vector<16x128xi32>
      %cst_22 = arith.constant 0.000000e+00 : f32
      %46 = vector.broadcast %cst_22 : f32 to vector<16x128xf32>
      %47 = arith.select %45, %42, %46 : vector<16x128xi1>, vector<16x128xf32>
      %c0_23 = arith.constant 0 : index
      %c0_24 = arith.constant 0 : index
      %48 = vector.load %arg7[%c0_23, %c0_24] : memref<16x128xf32, #tpu.memory_space<vmem>>, vector<16x128xf32>
      tpu.vector_store %arg7[%c0_23, %c0_24], %47 {strides = array<i32>} : memref<16x128xf32, #tpu.memory_space<vmem>>, vector<16x128xf32>,
    } else {
    }
    %c4_i32 = arith.constant 4 : i32
    %12 = arith.cmpi eq, %arg0, %c4_i32 : i32
    %13 = arith.extui %12 : i1 to i32
    %c0_i32_4 = arith.constant 0 : i32
    %14 = arith.cmpi ne, %13, %c0_i32_4 : i32
    scf.if %14 {
      %c0 = arith.constant 0 : index
      %c0_5 = arith.constant 0 : index
      %15 = vector.load %arg7[%c0, %c0_5] : memref<16x128xf32, #tpu.memory_space<vmem>>, vector<16x128xf32>
      %c0_6 = arith.constant 0 : index
      %c0_7 = arith.constant 0 : index
      %c0_8 = arith.constant 0 : index
      %16 = vector.load %arg6[%c0_6, %c0_7, %c0_8] : memref<3x16x128xf32, #tpu.memory_space<vmem>>, vector<1x16x128xf32>
      %17 = vector.shape_cast %16 : vector<1x16x128xf32> to vector<16x128xf32>
      %18 = arith.addf %15, %17 : vector<16x128xf32>
      %c1 = arith.constant 1 : index
      %c0_9 = arith.constant 0 : index
      %c0_10 = arith.constant 0 : index
      %19 = vector.load %arg6[%c1, %c0_9, %c0_10] : memref<3x16x128xf32, #tpu.memory_space<vmem>>, vector<1x16x128xf32>
      %20 = vector.shape_cast %19 : vector<1x16x128xf32> to vector<16x128xf32>
      %21 = arith.addf %18, %20 : vector<16x128xf32>
      %c2 = arith.constant 2 : index
      %c0_11 = arith.constant 0 : index
      %c0_12 = arith.constant 0 : index
      %22 = vector.load %arg6[%c2, %c0_11, %c0_12] : memref<3x16x128xf32, #tpu.memory_space<vmem>>, vector<1x16x128xf32>
      %23 = vector.shape_cast %22 : vector<1x16x128xf32> to vector<16x128xf32>
      %24 = arith.addf %21, %23 : vector<16x128xf32>
      %cst = arith.constant 0.000000e+00 : f32
      %25 = vector.broadcast %cst : f32 to vector<16x128xf32>
      %26 = arith.maximumf %24, %25 : vector<16x128xf32>
      %27 = arith.truncf %26 : vector<16x128xf32> to vector<16x128xbf16>
      %c0_13 = arith.constant 0 : index
      %c0_14 = arith.constant 0 : index
      %c0_15 = arith.constant 0 : index
      %28 = vector.load %arg3[%c0_13, %c0_14, %c0_15] : memref<1x128x128xbf16, #tpu.memory_space<vmem>>, vector<1x128x128xbf16>
      %29 = vector.shape_cast %28 : vector<1x128x128xbf16> to vector<128x128xbf16>
      %cst_16 = arith.constant dense<0.000000e+00> : vector<16x128xf32>
      %30 = tpu.matmul %27, %29, %cst_16 {dimension_numbers = #tpu.dot_dimension_numbers<[1], [0], [0], [1], [0, 0, 1, 1], [], []>} : vector<16x128xbf16>, vector<128x128xbf16>, vector<16x128xf32> -> vector<16x128xf32>
      %c0_17 = arith.constant 0 : index
      %c0_18 = arith.constant 0 : index
      %31 = vector.load %arg2[%c0_17, %c0_18] : memref<16x16xbf16, #tpu.memory_space<vmem>>, vector<16x16xbf16>
      %32 = arith.truncf %30 : vector<16x128xf32> to vector<16x128xbf16>
      %cst_19 = arith.constant dense<0.000000e+00> : vector<16x128xf32>
      %33 = tpu.matmul %31, %32, %cst_19 {dimension_numbers = #tpu.dot_dimension_numbers<[1], [0], [0], [1], [0, 0, 1, 1], [], []>} : vector<16x16xbf16>, vector<16x128xbf16>, vector<16x128xf32> -> vector<16x128xf32>
      %c0_20 = arith.constant 0 : index
      %c0_21 = arith.constant 0 : index
      %c0_22 = arith.constant 0 : index
      %34 = vector.load %arg4[%c0_20, %c0_21, %c0_22] : memref<1x1x128xf32, #tpu.memory_space<vmem>>, vector<1x1x128xf32>
      %35 = vector.shape_cast %34 : vector<1x1x128xf32> to vector<1x128xf32>
      %36 = vector.broadcast %35 : vector<1x128xf32> to vector<16x128xf32>
      %37 = arith.addf %33, %36 : vector<16x128xf32>
      %38 = tpu.iota {dimensions = array<i32: 1>} : vector<16x128xi32>
      %c32_i32 = arith.constant 32 : i32
      %39 = vector.broadcast %c32_i32 : i32 to vector<16x128xi32>
      %40 = arith.cmpi slt, %38, %39 : vector<16x128xi32>
      %cst_23 = arith.constant 0xFF800000 : f32
      %41 = vector.broadcast %cst_23 : f32 to vector<16x128xf32>
      %42 = arith.select %40, %37, %41 : vector<16x128xi1>, vector<16x128xf32>
      %cst_24 = arith.constant dense<0xFF800000> : vector<16xf32>
      %43 = vector.multi_reduction <maximumf>, %42, %cst_24 [1] : vector<16x128xf32> to vector<16xf32>
      %44 = vector.shape_cast %43 : vector<16xf32> to vector<16x1xf32>
      %45 = vector.broadcast %44 : vector<16x1xf32> to vector<16x128xf32>
      %46 = arith.subf %37, %45 : vector<16x128xf32>
      %47 = math.exp %46 : vector<16x128xf32>
      %cst_25 = arith.constant 0.000000e+00 : f32
      %48 = vector.broadcast %cst_25 : f32 to vector<16x128xf32>
      %49 = arith.select %40, %47, %48 : vector<16x128xi1>, vector<16x128xf32>
      %cst_26 = arith.constant dense<0.000000e+00> : vector<16xf32>
      %50 = vector.multi_reduction <add>, %49, %cst_26 [1] : vector<16x128xf32> to vector<16xf32>
      %51 = vector.shape_cast %50 : vector<16xf32> to vector<16x1xf32>
      %52 = vector.broadcast %51 : vector<16x1xf32> to vector<16x128xf32>
      %53 = arith.divf %49, %52 : vector<16x128xf32>
      %c0_27 = arith.constant 0 : index
      %c0_28 = arith.constant 0 : index
      %54 = vector.load %arg5[%c0_27, %c0_28] : memref<16x128xf32, #tpu.memory_space<vmem>>, vector<16x128xf32>
      tpu.vector_store %arg5[%c0_27, %c0_28], %53 {strides = array<i32>} : memref<16x128xf32, #tpu.memory_space<vmem>>, vector<16x128xf32>,
    } else {
    }
    return
  }
  func.func @transform_0(%arg0: i32) -> (i32, i32) {
    %c0_i32 = arith.constant 0 : i32
    %c0_i32_0 = arith.constant 0 : i32
    %c0_i32_1 = arith.constant 0 : i32
    return %c0_i32, %c0_i32_0 : i32, i32
  }
  func.func @transform_1(%arg0: i32) -> (i32, i32) {
    %c0_i32 = arith.constant 0 : i32
    %c0_i32_0 = arith.constant 0 : i32
    %c0_i32_1 = arith.constant 0 : i32
    return %c0_i32, %c0_i32_0 : i32, i32
  }
  func.func @transform_2(%arg0: i32) -> (i32, i32, i32) {
    %c0_i32 = arith.constant 0 : i32
    %c0_i32_0 = arith.constant 0 : i32
    %c0_i32_1 = arith.constant 0 : i32
    return %arg0, %c0_i32, %c0_i32_0 : i32, i32, i32
  }
  func.func @transform_3(%arg0: i32) -> (i32, i32, i32) {
    %c0_i32 = arith.constant 0 : i32
    %c0_i32_0 = arith.constant 0 : i32
    %c0_i32_1 = arith.constant 0 : i32
    return %arg0, %c0_i32, %c0_i32_0 : i32, i32, i32
  }
  func.func @transform_4(%arg0: i32) -> (i32, i32) {
    %c0_i32 = arith.constant 0 : i32
    %c0_i32_0 = arith.constant 0 : i32
    %c0_i32_1 = arith.constant 0 : i32
    return %c0_i32, %c0_i32_0 : i32, i32
  }
}

</mosaic_0001>

<bundles_post_ra>
// kernel: forward.1
= control target key start
LH: loop header
LB: loop body
LE: loop exit
PB: predicated region body
PF: predicated region fallthrough
CT: control target
= control target key end

     0   :  { %9 = vsyncpa [#allocation5], 0  ;;  %s2016_s0 = inlined_call_operand.vmem [shape: f32[16,128], index: 0, kind: input, shape index: {}]   ;;  %s2017_s1 = inlined_call_operand.vmem [shape: bf16[16,16], index: 1, kind: input, shape index: {}]   ;;  %s2018_s2 = inlined_call_operand.hbm [shape: bf16[5,128,128], index: 2, kind: input, shape index: {}]   ;;  %s2019_s3 = inlined_call_operand.vmem [shape: f32[5,1,128], index: 3, kind: input, shape index: {}]   ;;  %s2020_s4 = inlined_call_operand.hbm [shape: f32[16,128], index: 4, kind: output, shape index: {}]  }
   0x1   :  { %11 = vsyncpa [#allocation5 + $0x1], 0 }
   0x2   :  { %12 = vsyncpa [#allocation6], 0  ;;  %s1824_s15 = smov 0   ;;  %s1826_s16 = smov 0  }
   0x3   :  { %s1828_s17 = smov 0   ;;  %s1830_s18 = smov 0  }
   0x4 LB: > { %s1843_s19 = sadd.s32 4294967295, %s1781_s18   ;;  %s1846_s20 = sadd.s32 1, %s1781_s18   ;;  %s1781_s18 = sphi %s1830_s18, %s2029_s18   ;;  %s1777_s17 = sphi %s1828_s17, %s2028_s17   ;;  %s1773_s16 = sphi %s1826_s16, %s2027_s16   ;;  %s1769_s15 = sphi %s1824_s15, %s2026_s15  }
   0x5   : > { %s64_s21 = ssub.s32 %s1781_s18, %s1846_s20  ;;  %s67_s22 = sadd.s32 1, %s1777_s17 }
   0x6   : > { %p65_p0 = scmp.eq.s32.totalorder %s64_s21, 0  ;;  %p74_p1 = scmp.ne.s32.totalorder %s1777_s17, %s1773_s16 }
   0x7   : > { %p75_p2 = scmp.eq.s32.totalorder %s1781_s18, 0  ;;  %p80_p3 = scmp.ne.s32.totalorder %s1773_s16, %s1769_s15 }
   0x8   : > { %s1856_s23 = scalar_select %p65_p0, %s1777_s17, %s67_s22  }
   0x9   : > { %p76_p4 = por %p75_p2, %p74_p1  ;;  %p81_p5 = scmp.eq.s32.totalorder %s1843_s19, 0 }
   0xa   : > { %p1564_p6 = scmp.lt.s32.totalorder %s1781_s18, 5  ;;  %s157_s25 = sand.u32 1, %s1777_s17  }
   0xb   : > { %p1860_p7 = por %p81_p5, %p80_p3  ;;  %s1295_s26 = sshll.u32 %s157_s25, 6 }
   0xc   : > { %s1368_s27 = sshll.u32 %s1781_s18, 10  ;;  %s161_s5 = scalar_lea.vmem [#allocation4], %s1295_s26 }
   0xd   : > { %s2022_s24 = scalar_select %p1860_p7, 1, 0 }
   0xe   : > { %s1869_s30 = scalar_lea.hbm %s2018_s2, %s1368_s27  ;;  %s168_s6 = sshll.u32 %s161_s5, 4  ;;  %s1871_s6 = int_to_ptr.vmem [resolvable:$true] %s168_s6 }
   0xf   : > { %p1873_p8 = pnand %p1564_p6, %p76_p4  ;;  %s1878_s8 = scalar_lea.sflag [#allocation5], %s157_s25 }
  0x10   : > { %s1691_s9 = scalar_lea.hbm %s1869_s30, 1024  ;;  %s1696_s12 = scalar_lea.hbm %s2018_s2, 5120 }
  0x11   : > { %p1692_p10 = scmp.ne.s32.totalorder %s1869_s30, %s1691_s9  ;;  %p1693_p11 = pneg %p1873_p8 }
  0x12   : > { %p1697_p0 = scmp.lt.s32.totalorder %s1869_s30, %s2018_s2  ;;  %p1698_p1 = scmp.lt.s32.totalorder %s1696_s12, %s1691_s9 }
  0x13   : > { %p1694_p12 = pnand %p1693_p11, %p1692_p10 }
  0x14   : > { %p1699_p2 = por %p1698_p1, %p1697_p0 }
  0x15   : > { %p1695_p13 = pneg %p1694_p12 }
  0x17   : > { %p1700_p3 = pnand %p1699_p2, %p1695_p13 }
  0x19   : > { %1703 = shalt.err (!%p1700_p3)
}
  0x1a   : > { %s1704_s15 = scalar_lea.vmem %s1871_s6, 1024  ;;  %s1783_s21 = smov [#allocation4]  }
  0x1b   : > { %p1705_p4 = scmp.ne.s32.totalorder %s1871_s6, %s1704_s15  ;;  %s1709_s22 = sshll.u32 %s1783_s21, 4  ;;  %s1710_s22 = int_to_ptr.vmem [resolvable:$false] %s1709_s22 }
  0x1c   : > { %s1711_s25 = scalar_lea.vmem %s1710_s22, 2048  ;;  %p1712_p10 = scmp.lt.s32.totalorder %s1871_s6, %s1710_s22 }
  0x1d   : > { %p1707_p5 = pnand %p1705_p4, %p1693_p11  ;;  %p1713_p12 = scmp.lt.s32.totalorder %s1711_s25, %s1704_s15 }
  0x1f   : > { %p1708_p6 = pneg %p1707_p5  ;;  %p1714_p9 = por %p1713_p12, %p1712_p10 }
  0x21   : > { %p1715_p7 = pnand %p1714_p9, %p1708_p6 }
  0x23   : > { %1718 = shalt.err (!%p1715_p7)
}
  0x24   : > { %s1784_s26 = smov 64   ;;  %s1785_s27 = smov 4  }
  0x25   : > { %1563 = dma.hbm_to_vmem [thread:$0]  (!%p1873_p8), %s1869_s30, 1024, %s1871_s6, %s1878_s8, %s1784_s26, %s1784_s26, %s1785_s27  }
  0x26   : > { %p182_p11 = scmp.lt.s32.totalorder %s1781_s18, 6  ;;  %p2024_p13 = scmp.ge.s32.totalorder %s1781_s18, 1 }
  0x28   : > { %p183_p0 = pnand %p2024_p13, %p182_p11 }
  0x29   : > { %s188_s28 = sand.u32 (!%p183_p0), 1, %s1773_s16   ;;  %p2025_p7 = scmp.ne.s32.totalorder (!%p183_p0), %s2022_s24, 0 }
  0x2a   : > { %186 = sbr.rel (%p183_p0) target bundleno = 2709 (0xa95), region = 36  ;;  %s1299_s29 = sshll.u32 (!%p183_p0), %s188_s28, 6 }
  0x2b   : > { %s189_s5 = scalar_lea.sflag (!%p183_p0), [#allocation5], %s188_s28  ;;  %s1903_s9 = scalar_lea.vmem (!%p183_p0), [#allocation4], %s1299_s29 }
  0x2f   : > { %1760 = dma.done.wait (%p2025_p7), %s189_s5, 1024  }
  0x30   : > { %1762 = vsyncadd (%p2025_p7), %s189_s5, 4294966272  ;;  %p215_p9 = scmp.lt.s32.totalorder %s1843_s19, 4  ;;  %p1300_p8 = scmp.ne.s32.totalorder %s1843_s19, 0 }
  0x32   : > { %s216_s30 = scalar_select %p215_p9, %s1843_s19, 4 }
  0x33   : > { %222 = sbr.rel (%p1300_p8) target bundleno = 512 (0x200), region = 44 }
  0x34   : > { %s1914_s7 = scalar_lea.vmem %s2019_s3, %s216_s30 }
  0x38   : > { %v1614_v0 = vld [vmem:[%s1903_s9 + $0x38] sm:$0xff]   ;;  %v1786_v1 = vmov 0.0   ;;  %v1615_v2 = vld [vmem:[%s1903_s9 + $0x30] sm:$0xff]   ;;  %vm1787_vm0 = vmmov 0   ;;  %v1616_v3 = vld [vmem:[%s1903_s9 + $0x28] sm:$0xff]   ;;  %vm348_vm1 = vcmask 130048  }
  0x39   : > { %1424 = vmatprep.subr.bf16.mxu0 %v1786_v1  ;;  %1444 = vmatprep.subr.bf16.mxu1 %v1786_v1  ;;  %v1617_v4 = vld [vmem:[%s1903_s9 + $0x20] sm:$0xff]   ;;  %v1618_v5 = vld [vmem:[%s1903_s9 + $0x18] sm:$0xff]   ;;  %v1619_v6 = vld [vmem:[%s1903_s9 + $0x10] sm:$0xff]  }
  0x3a   : > { %1425 = vmatpush3.bf16.msra.mxu0 %v1614_v0  ;;  %1440 = vmatprep.mubr.msk.bf16.mxu0 %vm1787_vm0, %v1786_v1  ;;  %v1620_v7 = vld [vmem:[%s1903_s9 + $0x8] sm:$0xff]   ;;  %v223_v8 = vld [vmem:[%s2016_s0] sm:$0xff] }
  0x3b   : > { %1426 = vmatprep.subr.bf16.mxu0 %v1786_v1  ;;  %1446 = vmatprep.mubr.msk.bf16.mxu1 %vm1787_vm0, %v1786_v1  ;;  %v224_v9 = vld [vmem:[%s2016_s0 + $0x8] sm:$0xff]  ;;  %v225_v10 = vmax.f32 %v223_v8, 0.0  ;;  %v1621_v12 = vld [vmem:[%s1903_s9] sm:$0xff]  }
  0x3c   : > { %v226_v11 = vmax.f32 %v224_v9, 0.0  ;;  %v1622_v19 = vld [vmem:[%s2017_s1] sm:$0xff]  }
  0x3d   : > { %v1309_v20 = vld [vmem:[%s1914_s7] ss:$0 sm:$0xff] }
  0x3e   : > { %1427 = vmatpush3.bf16.msra.mxu0 %v1615_v2  ;;  %v227_v13 = vpack.c.bf16 %v226_v11, %v225_v10 }
  0x3f   : > { %1428 = vmatprep.subr.bf16.mxu0 %v1786_v1 }
  0x42   : > { %1429 = vmatpush3.bf16.msra.mxu0 %v1616_v3 }
  0x43   : > { %1430 = vmatprep.subr.bf16.mxu0 %v1786_v1 }
  0x46   : > { %1431 = vmatpush3.bf16.msra.mxu0 %v1617_v4 }
  0x47   : > { %1432 = vmatprep.subr.bf16.mxu0 %v1786_v1 }
  0x4a   : > { %1433 = vmatpush3.bf16.msra.mxu0 %v1618_v5 }
  0x4b   : > { %1434 = vmatprep.subr.bf16.mxu0 %v1786_v1 }
  0x4e   : > { %1435 = vmatpush3.bf16.msra.mxu0 %v1619_v6 }
  0x4f   : > { %1436 = vmatprep.subr.bf16.mxu0 %v1786_v1 }
  0x52   : > { %1437 = vmatpush3.bf16.msra.mxu0 %v1620_v7 }
  0x53   : > { %1438 = vmatprep.subr.bf16.mxu0 %v1786_v1 }
  0x56   : > { %1439 = vmatpush3.bf16.msra.mxu0 %v1621_v12 }
  0x59   : > { %1441 = vmatmul.mubr.bf16.vlgmr.msra.gmra.mxu0 %v227_v13 }
 0x119   : > { %v326_v14 = vpop.f32.mrf.mxu0 }
 0x11b   : > { %v1442_v15 = vpop.f32.mrf.mxu0 }
 0x11d   : > { %v329_v16 = vpop.f32.mrf.mxu0 }
 0x11e   : > { %v335_v17 = vpack.c.bf16 %v329_v16, %v326_v14 }
 0x11f   : > { %v1443_v18 = vpop.f32.mrf.mxu0 }
 0x120   : > { %1445 = vmatpush3.bf16.msra.mxu1 %v335_v17 }
 0x123   : > { %1447 = vmatmul.mubr.msk.bf16.vlgmr.msra.gmra.mxu1 %vm348_vm1, %v1622_v19 }
 0x1e3   : > { %v386_v21 = vpop.f32.mrf.mxu1 }
 0x1e4   : > { %v387_v22 = vadd.f32 %v1309_v20, %v386_v21 }
 0x1e5   : > { %v1448_v23 = vpop.f32.mrf.mxu1 }
 0x1e6   : > { %v395_v24 = vmin.f32 %v387_v22, 0.0  ;;  %vm393_vm2 = vcmp.gt.f32.partialorder %v387_v22, 0.0 }
 0x1e7   : > { %v389_v25 = vpop.f32.mrf.mxu1 }
 0x1e8   : > { %v397_v26 = vmul.f32 1.442695, %v395_v24  ;;  %v390_v27 = vadd.f32 %v1309_v20, %v389_v25 }
 0x1e9   : > { %v1449_v28 = vpop.f32.mrf.mxu1 }
 0x1ea   : > { %1623 = vpow2.f32 %v397_v26  ;;  %v396_v29 = vmin.f32 %v390_v27, 0.0  ;;  %vm394_vm3 = vcmp.gt.f32.partialorder %v390_v27, 0.0 }
 0x1ec   : > { %v399_v30 = vmul.f32 1.442695, %v396_v29 }
 0x1ee   : > { %1625 = vpow2.f32 %v399_v30 }
 0x1f7   : > { %v1624_v31 = vpop.eup %1623 }
 0x1f8   : > { %v1312_v32 = vadd.f32 -1.0, %v1624_v31 }
 0x1fa   : > { %v403_v33 = vsel %vm393_vm2, %v387_v22, %v1312_v32 }
 0x1fb   : > { %v1626_v34 = vpop.eup %1625  ;;  %405 = vst [vmem:[#allocation2 + $0x28] sm:$0xff] %v403_v33  ;;  %407 = vst [vmem:[#allocation3] sm:$0xff] %v403_v33 }
 0x1fc   : > { %v1313_v35 = vadd.f32 -1.0, %v1626_v34 }
 0x1fe   : > { %v404_v36 = vsel %vm394_vm3, %v390_v27, %v1313_v35 }
 0x1ff   : > { %406 = vst [vmem:[#allocation2 + $0x10] sm:$0xff] %v404_v36  ;;  %408 = vst [vmem:[#allocation3 + $0x8] sm:$0xff] %v404_v36 }
 0x200 PF: > { %p1314_p1 = scmp.ne.s32.totalorder %s1843_s19, 1 }
 0x202   : > { %412 = sbr.rel (%p1314_p1) target bundleno = 975 (0x3cf), region = 48 }
 0x207   : > { %v1627_v37 = vld [vmem:[%s1903_s9 + $0x38] sm:$0xff]   ;;  %v1788_v38 = vmov 0.0   ;;  %v1628_v39 = vld [vmem:[%s1903_s9 + $0x30] sm:$0xff]   ;;  %vm1789_vm4 = vmmov 0   ;;  %v1629_v40 = vld [vmem:[%s1903_s9 + $0x28] sm:$0xff]   ;;  %vm538_vm5 = vcmask 130048  }
 0x208   : > { %1450 = vmatprep.subr.bf16.mxu0 %v1788_v38  ;;  %1470 = vmatprep.subr.bf16.mxu1 %v1788_v38  ;;  %v1630_v41 = vld [vmem:[%s1903_s9 + $0x20] sm:$0xff]   ;;  %v1631_v42 = vld [vmem:[%s1903_s9 + $0x18] sm:$0xff]   ;;  %v1632_v43 = vld [vmem:[%s1903_s9 + $0x10] sm:$0xff]  }
 0x209   : > { %1451 = vmatpush3.bf16.msra.mxu0 %v1627_v37  ;;  %1466 = vmatprep.mubr.msk.bf16.mxu0 %vm1789_vm4, %v1788_v38  ;;  %v1633_v44 = vld [vmem:[%s1903_s9 + $0x8] sm:$0xff]   ;;  %v413_v45 = vld [vmem:[#allocation3] sm:$0xff]  ;;  %v414_v46 = vld [vmem:[#allocation3 + $0x8] sm:$0xff] }
 0x20a   : > { %1452 = vmatprep.subr.bf16.mxu0 %v1788_v38  ;;  %1472 = vmatprep.mubr.msk.bf16.mxu1 %vm1789_vm4, %v1788_v38  ;;  %v415_v47 = vmax.f32 %v413_v45, 0.0  ;;  %v416_v48 = vmax.f32 %v414_v46, 0.0  ;;  %v1634_v49 = vld [vmem:[%s1903_s9] sm:$0xff]  }
 0x20b   : > { %v1635_v56 = vld [vmem:[%s2017_s1] sm:$0xff]  }
 0x20c   : > { %v417_v50 = vpack.c.bf16 %v416_v48, %v415_v47  ;;  %v1323_v57 = vld [vmem:[%s1914_s7] ss:$0 sm:$0xff] }
 0x20d   : > { %1453 = vmatpush3.bf16.msra.mxu0 %v1628_v39 }
 0x20e   : > { %1454 = vmatprep.subr.bf16.mxu0 %v1788_v38 }
 0x211   : > { %1455 = vmatpush3.bf16.msra.mxu0 %v1629_v40 }
 0x212   : > { %1456 = vmatprep.subr.bf16.mxu0 %v1788_v38 }
 0x215   : > { %1457 = vmatpush3.bf16.msra.mxu0 %v1630_v41 }
 0x216   : > { %1458 = vmatprep.subr.bf16.mxu0 %v1788_v38 }
 0x219   : > { %1459 = vmatpush3.bf16.msra.mxu0 %v1631_v42 }
 0x21a   : > { %1460 = vmatprep.subr.bf16.mxu0 %v1788_v38 }
 0x21d   : > { %1461 = vmatpush3.bf16.msra.mxu0 %v1632_v43 }
 0x21e   : > { %1462 = vmatprep.subr.bf16.mxu0 %v1788_v38 }
 0x221   : > { %1463 = vmatpush3.bf16.msra.mxu0 %v1633_v44 }
 0x222   : > { %1464 = vmatprep.subr.bf16.mxu0 %v1788_v38 }
 0x225   : > { %1465 = vmatpush3.bf16.msra.mxu0 %v1634_v49 }
 0x228   : > { %1467 = vmatmul.mubr.bf16.vlgmr.msra.gmra.mxu0 %v417_v50 }
 0x2e8   : > { %v516_v51 = vpop.f32.mrf.mxu0 }
 0x2ea   : > { %v1468_v52 = vpop.f32.mrf.mxu0 }
 0x2ec   : > { %v519_v53 = vpop.f32.mrf.mxu0 }
 0x2ed   : > { %v525_v54 = vpack.c.bf16 %v519_v53, %v516_v51 }
 0x2ee   : > { %v1469_v55 = vpop.f32.mrf.mxu0 }
 0x2ef   : > { %1471 = vmatpush3.bf16.msra.mxu1 %v525_v54 }
 0x2f2   : > { %1473 = vmatmul.mubr.msk.bf16.vlgmr.msra.gmra.mxu1 %vm538_vm5, %v1635_v56 }
 0x3b2   : > { %v576_v58 = vpop.f32.mrf.mxu1 }
 0x3b3   : > { %v577_v59 = vadd.f32 %v1323_v57, %v576_v58 }
 0x3b4   : > { %v1474_v60 = vpop.f32.mrf.mxu1 }
 0x3b5   : > { %v585_v61 = vmin.f32 %v577_v59, 0.0  ;;  %vm583_vm6 = vcmp.gt.f32.partialorder %v577_v59, 0.0 }
 0x3b6   : > { %v579_v62 = vpop.f32.mrf.mxu1 }
 0x3b7   : > { %v587_v63 = vmul.f32 1.442695, %v585_v61  ;;  %v580_v0 = vadd.f32 %v1323_v57, %v579_v62 }
 0x3b8   : > { %v1475_v1 = vpop.f32.mrf.mxu1 }
 0x3b9   : > { %1636 = vpow2.f32 %v587_v63  ;;  %v586_v2 = vmin.f32 %v580_v0, 0.0  ;;  %vm584_vm7 = vcmp.gt.f32.partialorder %v580_v0, 0.0 }
 0x3bb   : > { %v589_v3 = vmul.f32 1.442695, %v586_v2 }
 0x3bd   : > { %1638 = vpow2.f32 %v589_v3 }
 0x3c6   : > { %v1637_v4 = vpop.eup %1636 }
 0x3c7   : > { %v1326_v5 = vadd.f32 -1.0, %v1637_v4 }
 0x3c9   : > { %v593_v6 = vsel %vm583_vm6, %v577_v59, %v1326_v5 }
 0x3ca   : > { %v1639_v7 = vpop.eup %1638  ;;  %596 = vst [vmem:[#allocation2 + $0x8] sm:$0xff] %v593_v6  ;;  %598 = vst [vmem:[#allocation3] sm:$0xff] %v593_v6 }
 0x3cb   : > { %v1327_v8 = vadd.f32 -1.0, %v1639_v7 }
 0x3cd   : > { %v594_v9 = vsel %vm584_vm7, %v580_v0, %v1327_v8 }
 0x3ce   : > { %597 = vst [vmem:[#allocation2] sm:$0xff] %v594_v9  ;;  %599 = vst [vmem:[#allocation3 + $0x8] sm:$0xff] %v594_v9 }
 0x3cf PF: > { %p1328_p2 = scmp.ne.s32.totalorder %s1843_s19, 2 }
 0x3d1   : > { %603 = sbr.rel (%p1328_p2) target bundleno = 1457 (0x5b1), region = 52 }
 0x3d6   : > { %v1640_v10 = vld [vmem:[%s1903_s9 + $0x38] sm:$0xff]   ;;  %v1790_v11 = vmov 0.0   ;;  %v1641_v12 = vld [vmem:[%s1903_s9 + $0x30] sm:$0xff]   ;;  %vm1791_vm8 = vmmov 0   ;;  %v1642_v13 = vld [vmem:[%s1903_s9 + $0x28] sm:$0xff]   ;;  %vm733_vm9 = vcmask 130048   ;;  %v796_v51 = vlaneseq }
 0x3d7   : > { %1476 = vmatprep.subr.bf16.mxu0 %v1790_v11  ;;  %1496 = vmatprep.subr.bf16.mxu1 %v1790_v11  ;;  %v1643_v14 = vld [vmem:[%s1903_s9 + $0x20] sm:$0xff]   ;;  %v1644_v15 = vld [vmem:[%s1903_s9 + $0x18] sm:$0xff]   ;;  %v1645_v16 = vld [vmem:[%s1903_s9 + $0x10] sm:$0xff]  }
 0x3d8   : > { %1477 = vmatpush3.bf16.msra.mxu0 %v1640_v10  ;;  %1492 = vmatprep.mubr.msk.bf16.mxu0 %vm1791_vm8, %v1790_v11  ;;  %v604_v17 = vld [vmem:[#allocation3] sm:$0xff]  ;;  %v605_v18 = vld [vmem:[#allocation3 + $0x8] sm:$0xff]  ;;  %v606_v19 = vld [vmem:[#allocation2 + $0x28] sm:$0xff]  ;;  %v797_v52 = vand.u32 127, %v796_v51 }
 0x3d9   : > { %1478 = vmatprep.subr.bf16.mxu0 %v1790_v11  ;;  %1498 = vmatprep.mubr.msk.bf16.mxu1 %vm1791_vm8, %v1790_v11  ;;  %v607_v20 = vld [vmem:[#allocation2 + $0x10] sm:$0xff]  ;;  %v608_v21 = vadd.f32 %v606_v19, %v604_v17  ;;  %v1646_v23 = vld [vmem:[%s1903_s9 + $0x8] sm:$0xff]   ;;  %v1647_v26 = vld [vmem:[%s1903_s9] sm:$0xff]  }
 0x3da   : > { %v609_v22 = vadd.f32 %v607_v20, %v605_v18  ;;  %v1648_v33 = vld [vmem:[%s2017_s1] sm:$0xff]   ;;  %vm798_vm10 = vcmp.lt.s32.totalorder %v797_v52, 32 }
 0x3db   : > { %v610_v24 = vmax.f32 %v608_v21, 0.0  ;;  %v1337_v34 = vld [vmem:[%s1914_s7] ss:$0 sm:$0xff] }
 0x3dc   : > { %1479 = vmatpush3.bf16.msra.mxu0 %v1641_v12  ;;  %v611_v25 = vmax.f32 %v609_v22, 0.0 }
 0x3dd   : > { %1480 = vmatprep.subr.bf16.mxu0 %v1790_v11 }
 0x3de   : > { %v612_v27 = vpack.c.bf16 %v611_v25, %v610_v24 }
 0x3e0   : > { %1481 = vmatpush3.bf16.msra.mxu0 %v1642_v13 }
 0x3e1   : > { %1482 = vmatprep.subr.bf16.mxu0 %v1790_v11 }
 0x3e4   : > { %1483 = vmatpush3.bf16.msra.mxu0 %v1643_v14 }
 0x3e5   : > { %1484 = vmatprep.subr.bf16.mxu0 %v1790_v11 }
 0x3e8   : > { %1485 = vmatpush3.bf16.msra.mxu0 %v1644_v15 }
 0x3e9   : > { %1486 = vmatprep.subr.bf16.mxu0 %v1790_v11 }
 0x3ec   : > { %1487 = vmatpush3.bf16.msra.mxu0 %v1645_v16 }
 0x3ed   : > { %1488 = vmatprep.subr.bf16.mxu0 %v1790_v11 }
 0x3f0   : > { %1489 = vmatpush3.bf16.msra.mxu0 %v1646_v23 }
 0x3f1   : > { %1490 = vmatprep.subr.bf16.mxu0 %v1790_v11 }
 0x3f4   : > { %1491 = vmatpush3.bf16.msra.mxu0 %v1647_v26 }
 0x3f7   : > { %1493 = vmatmul.mubr.bf16.vlgmr.msra.gmra.mxu0 %v612_v27 }
 0x4b7   : > { %v711_v28 = vpop.f32.mrf.mxu0 }
 0x4b9   : > { %v1494_v29 = vpop.f32.mrf.mxu0 }
 0x4bb   : > { %v714_v30 = vpop.f32.mrf.mxu0 }
 0x4bc   : > { %v720_v31 = vpack.c.bf16 %v714_v30, %v711_v28 }
 0x4bd   : > { %v1495_v32 = vpop.f32.mrf.mxu0 }
 0x4be   : > { %1497 = vmatpush3.bf16.msra.mxu1 %v720_v31 }
 0x4c1   : > { %1499 = vmatmul.mubr.msk.bf16.vlgmr.msra.gmra.mxu1 %vm733_vm9, %v1648_v33 }
 0x581   : > { %v771_v35 = vpop.f32.mrf.mxu1 }
 0x582   : > { %v772_v36 = vadd.f32 %v1337_v34, %v771_v35 }
 0x583   : > { %v1500_v37 = vpop.f32.mrf.mxu1 }
 0x584   : > { %v778_v38 = vand.u32 2147483647, %v772_v36  ;;  %vm790_vm11 = vcmp.ge.f32.partialorder %v772_v36, 0.0 }
 0x585   : > { %v774_v39 = vpop.f32.mrf.mxu1 }
 0x586   : > { %v780_v40 = vsub.f32 0.0, %v778_v38  ;;  %v775_v41 = vadd.f32 %v1337_v34, %v774_v39 }
 0x587   : > { %v1501_v42 = vpop.f32.mrf.mxu1 }
 0x588   : > { %v782_v43 = vmul.f32 1.442695, %v780_v40  ;;  %v779_v44 = vand.u32 2147483647, %v775_v41  ;;  %vm791_vm12 = vcmp.ge.f32.partialorder %v775_v41, 0.0 }
 0x58a   : > { %1649 = vpow2.f32 %v782_v43  ;;  %v781_v45 = vsub.f32 0.0, %v779_v44 }
 0x58c   : > { %v784_v46 = vmul.f32 1.442695, %v781_v45 }
 0x58e   : > { %1651 = vpow2.f32 %v784_v46 }
 0x597   : > { %v1650_v47 = vpop.eup %1649 }
 0x598   : > { %v786_v48 = vadd.f32 1.0, %v1650_v47 }
 0x59a   : > { %1653 = vrcp.f32 %v786_v48 }
 0x59b   : > { %v1652_v49 = vpop.eup %1651 }
 0x59c   : > { %v787_v50 = vadd.f32 1.0, %v1652_v49 }
 0x59e   : > { %1655 = vrcp.f32 %v787_v50 }
 0x5a7   : > { %v1654_v53 = vpop.eup %1653 }
 0x5a8   : > { %v792_v54 = vmul.f32 %v1654_v53, %v1650_v47 }
 0x5aa   : > { %v794_v55 = vsel %vm790_vm11, %v1654_v53, %v792_v54 }
 0x5ab   : > { %v1656_v56 = vpop.eup %1655  ;;  %v799_v57 = vsel %vm798_vm10, %v794_v55, 0.0 }
 0x5ac   : > { %802 = vst [vmem:[#allocation2 + $0x18] sm:$0xff] %v799_v57  ;;  %804 = vst [vmem:[#allocation3] sm:$0xff] %v799_v57  ;;  %v793_v58 = vmul.f32 %v1656_v56, %v1652_v49 }
 0x5ae   : > { %v795_v59 = vsel %vm791_vm12, %v1656_v56, %v793_v58 }
 0x5af   : > { %v800_v60 = vsel %vm798_vm10, %v795_v59, 0.0 }
 0x5b0   : > { %803 = vst [vmem:[#allocation2 + $0x20] sm:$0xff] %v800_v60  ;;  %805 = vst [vmem:[#allocation3 + $0x8] sm:$0xff] %v800_v60 }
 0x5b1 PF: > { %p1340_p3 = scmp.ne.s32.totalorder %s1843_s19, 3 }
 0x5b3   : > { %809 = sbr.rel (%p1340_p3) target bundleno = 1939 (0x793), region = 56 }
 0x5b8   : > { %v1657_v61 = vld [vmem:[%s1903_s9 + $0x38] sm:$0xff]   ;;  %v1792_v62 = vmov 0.0   ;;  %v1658_v63 = vld [vmem:[%s1903_s9 + $0x30] sm:$0xff]   ;;  %vm1793_vm13 = vmmov 0   ;;  %v1659_v0 = vld [vmem:[%s1903_s9 + $0x28] sm:$0xff]   ;;  %vm939_vm14 = vcmask 130048   ;;  %v1002_v38 = vlaneseq }
 0x5b9   : > { %1502 = vmatprep.subr.bf16.mxu0 %v1792_v62  ;;  %1522 = vmatprep.subr.bf16.mxu1 %v1792_v62  ;;  %v1660_v1 = vld [vmem:[%s1903_s9 + $0x20] sm:$0xff]   ;;  %v1661_v2 = vld [vmem:[%s1903_s9 + $0x18] sm:$0xff]   ;;  %v1662_v3 = vld [vmem:[%s1903_s9 + $0x10] sm:$0xff]  }
 0x5ba   : > { %1503 = vmatpush3.bf16.msra.mxu0 %v1657_v61  ;;  %1518 = vmatprep.mubr.msk.bf16.mxu0 %vm1793_vm13, %v1792_v62  ;;  %v810_v4 = vld [vmem:[#allocation3] sm:$0xff]  ;;  %v811_v5 = vld [vmem:[#allocation3 + $0x8] sm:$0xff]  ;;  %v812_v6 = vld [vmem:[#allocation2 + $0x28] sm:$0xff]  ;;  %v1003_v39 = vand.u32 127, %v1002_v38 }
 0x5bb   : > { %1504 = vmatprep.subr.bf16.mxu0 %v1792_v62  ;;  %1524 = vmatprep.mubr.msk.bf16.mxu1 %vm1793_vm13, %v1792_v62  ;;  %v813_v7 = vld [vmem:[#allocation2 + $0x10] sm:$0xff]  ;;  %v814_v8 = vadd.f32 %v812_v6, %v810_v4  ;;  %v1663_v10 = vld [vmem:[%s1903_s9 + $0x8] sm:$0xff]   ;;  %v1664_v13 = vld [vmem:[%s1903_s9] sm:$0xff]  }
 0x5bc   : > { %v815_v9 = vadd.f32 %v813_v7, %v811_v5  ;;  %v1665_v20 = vld [vmem:[%s2017_s1] sm:$0xff]   ;;  %vm1004_vm15 = vcmp.lt.s32.totalorder %v1003_v39, 32 }
 0x5bd   : > { %v816_v11 = vmax.f32 %v814_v8, 0.0  ;;  %v1349_v21 = vld [vmem:[%s1914_s7] ss:$0 sm:$0xff] }
 0x5be   : > { %1505 = vmatpush3.bf16.msra.mxu0 %v1658_v63  ;;  %v817_v12 = vmax.f32 %v815_v9, 0.0 }
 0x5bf   : > { %1506 = vmatprep.subr.bf16.mxu0 %v1792_v62 }
 0x5c0   : > { %v818_v14 = vpack.c.bf16 %v817_v12, %v816_v11 }
 0x5c2   : > { %1507 = vmatpush3.bf16.msra.mxu0 %v1659_v0 }
 0x5c3   : > { %1508 = vmatprep.subr.bf16.mxu0 %v1792_v62 }
 0x5c6   : > { %1509 = vmatpush3.bf16.msra.mxu0 %v1660_v1 }
 0x5c7   : > { %1510 = vmatprep.subr.bf16.mxu0 %v1792_v62 }
 0x5ca   : > { %1511 = vmatpush3.bf16.msra.mxu0 %v1661_v2 }
 0x5cb   : > { %1512 = vmatprep.subr.bf16.mxu0 %v1792_v62 }
 0x5ce   : > { %1513 = vmatpush3.bf16.msra.mxu0 %v1662_v3 }
 0x5cf   : > { %1514 = vmatprep.subr.bf16.mxu0 %v1792_v62 }
 0x5d2   : > { %1515 = vmatpush3.bf16.msra.mxu0 %v1663_v10 }
 0x5d3   : > { %1516 = vmatprep.subr.bf16.mxu0 %v1792_v62 }
 0x5d6   : > { %1517 = vmatpush3.bf16.msra.mxu0 %v1664_v13 }
 0x5d9   : > { %1519 = vmatmul.mubr.bf16.vlgmr.msra.gmra.mxu0 %v818_v14 }
 0x699   : > { %v917_v15 = vpop.f32.mrf.mxu0 }
 0x69b   : > { %v1520_v16 = vpop.f32.mrf.mxu0 }
 0x69d   : > { %v920_v17 = vpop.f32.mrf.mxu0 }
 0x69e   : > { %v926_v18 = vpack.c.bf16 %v920_v17, %v917_v15 }
 0x69f   : > { %v1521_v19 = vpop.f32.mrf.mxu0 }
 0x6a0   : > { %1523 = vmatpush3.bf16.msra.mxu1 %v926_v18 }
 0x6a3   : > { %1525 = vmatmul.mubr.msk.bf16.vlgmr.msra.gmra.mxu1 %vm939_vm14, %v1665_v20 }
 0x763   : > { %v977_v22 = vpop.f32.mrf.mxu1 }
 0x764   : > { %v978_v23 = vadd.f32 %v1349_v21, %v977_v22 }
 0x765   : > { %v1526_v24 = vpop.f32.mrf.mxu1 }
 0x766   : > { %v984_v25 = vand.u32 2147483647, %v978_v23  ;;  %vm996_vm0 = vcmp.ge.f32.partialorder %v978_v23, 0.0 }
 0x767   : > { %v980_v26 = vpop.f32.mrf.mxu1 }
 0x768   : > { %v986_v27 = vsub.f32 0.0, %v984_v25  ;;  %v981_v28 = vadd.f32 %v1349_v21, %v980_v26 }
 0x769   : > { %v1527_v29 = vpop.f32.mrf.mxu1 }
 0x76a   : > { %v988_v30 = vmul.f32 1.442695, %v986_v27  ;;  %v985_v31 = vand.u32 2147483647, %v981_v28  ;;  %vm997_vm1 = vcmp.ge.f32.partialorder %v981_v28, 0.0 }
 0x76c   : > { %1666 = vpow2.f32 %v988_v30  ;;  %v987_v32 = vsub.f32 0.0, %v985_v31 }
 0x76e   : > { %v990_v33 = vmul.f32 1.442695, %v987_v32 }
 0x770   : > { %1668 = vpow2.f32 %v990_v33 }
 0x779   : > { %v1667_v34 = vpop.eup %1666 }
 0x77a   : > { %v992_v35 = vadd.f32 1.0, %v1667_v34 }
 0x77c   : > { %1670 = vrcp.f32 %v992_v35 }
 0x77d   : > { %v1669_v36 = vpop.eup %1668 }
 0x77e   : > { %v993_v37 = vadd.f32 1.0, %v1669_v36 }
 0x780   : > { %1672 = vrcp.f32 %v993_v37 }
 0x789   : > { %v1671_v40 = vpop.eup %1670 }
 0x78a   : > { %v998_v41 = vmul.f32 %v1671_v40, %v1667_v34 }
 0x78c   : > { %v1000_v42 = vsel %vm996_vm0, %v1671_v40, %v998_v41 }
 0x78d   : > { %v1673_v43 = vpop.eup %1672  ;;  %v1005_v44 = vsel %vm1004_vm15, %v1000_v42, 0.0 }
 0x78e   : > { %1007 = vst [vmem:[#allocation3] sm:$0xff] %v1005_v44  ;;  %v999_v45 = vmul.f32 %v1673_v43, %v1669_v36 }
 0x790   : > { %v1001_v46 = vsel %vm997_vm1, %v1673_v43, %v999_v45 }
 0x791   : > { %v1006_v47 = vsel %vm1004_vm15, %v1001_v46, 0.0 }
 0x792   : > { %1008 = vst [vmem:[#allocation3 + $0x8] sm:$0xff] %v1006_v47 }
 0x793 PF: > { %p1352_p4 = scmp.ne.s32.totalorder %s1843_s19, 4 }
 0x795   : > { %1012 = sbr.rel (%p1352_p4) target bundleno = 2693 (0xa85), region = 60 }
 0x79a   : > { %v1674_v48 = vld [vmem:[%s1903_s9 + $0x38] sm:$0xff]   ;;  %v1794_v49 = vmov 0.0   ;;  %v1675_v50 = vld [vmem:[%s1903_s9 + $0x30] sm:$0xff]   ;;  %vm1795_vm2 = vmmov 0   ;;  %v1676_v51 = vld [vmem:[%s1903_s9 + $0x28] sm:$0xff]   ;;  %vm1152_vm3 = vcmask 130048   ;;  %v1197_v16 = vlaneseq }
 0x79b   : > { %1528 = vmatprep.subr.bf16.mxu0 %v1794_v49  ;;  %1548 = vmatprep.subr.bf16.mxu1 %v1794_v49  ;;  %v1677_v52 = vld [vmem:[%s1903_s9 + $0x20] sm:$0xff]   ;;  %v1013_v53 = vld [vmem:[#allocation3] sm:$0xff]  ;;  %v1014_v54 = vld [vmem:[#allocation3 + $0x8] sm:$0xff] }
 0x79c   : > { %1529 = vmatpush3.bf16.msra.mxu0 %v1674_v48  ;;  %1544 = vmatprep.mubr.msk.bf16.mxu0 %vm1795_vm2, %v1794_v49  ;;  %v1015_v55 = vld [vmem:[#allocation2 + $0x28] sm:$0xff]  ;;  %v1016_v56 = vld [vmem:[#allocation2 + $0x10] sm:$0xff]  ;;  %v1678_v59 = vld [vmem:[%s1903_s9 + $0x18] sm:$0xff]   ;;  %v1198_v17 = vand.u32 127, %v1197_v16 }
 0x79d   : > { %1530 = vmatprep.subr.bf16.mxu0 %v1794_v49  ;;  %1550 = vmatprep.mubr.msk.bf16.mxu1 %vm1795_vm2, %v1794_v49  ;;  %v1017_v57 = vadd.f32 %v1015_v55, %v1013_v53  ;;  %v1018_v58 = vadd.f32 %v1016_v56, %v1014_v54  ;;  %v1020_v60 = vld [vmem:[#allocation2 + $0x8] sm:$0xff]  ;;  %v1021_v61 = vld [vmem:[#allocation2] sm:$0xff]  ;;  %v1679_v0 = vld [vmem:[%s1903_s9 + $0x10] sm:$0xff]  }
 0x79e   : > { %v1025_v1 = vld [vmem:[#allocation2 + $0x18] sm:$0xff]  ;;  %v1026_v2 = vld [vmem:[#allocation2 + $0x20] sm:$0xff]  ;;  %v1680_v5 = vld [vmem:[%s1903_s9 + $0x8] sm:$0xff]   ;;  %vm1199_vm4 = vcmp.lt.s32.totalorder %v1198_v17, 32 }
 0x79f   : > { %v1022_v62 = vadd.f32 %v1020_v60, %v1017_v57  ;;  %v1023_v63 = vadd.f32 %v1021_v61, %v1018_v58  ;;  %v1681_v8 = vld [vmem:[%s1903_s9] sm:$0xff]  }
 0x7a0   : > { %1531 = vmatpush3.bf16.msra.mxu0 %v1675_v50  ;;  %v1682_v15 = vld [vmem:[%s2017_s1] sm:$0xff]  }
 0x7a1   : > { %1532 = vmatprep.subr.bf16.mxu0 %v1794_v49  ;;  %v1027_v3 = vadd.f32 %v1025_v1, %v1022_v62  ;;  %v1028_v4 = vadd.f32 %v1026_v2, %v1023_v63  ;;  %v1361_v18 = vld [vmem:[%s1914_s7] ss:$0 sm:$0xff] }
 0x7a3   : > { %v1029_v6 = vmax.f32 %v1027_v3, 0.0  ;;  %v1030_v7 = vmax.f32 %v1028_v4, 0.0 }
 0x7a4   : > { %1533 = vmatpush3.bf16.msra.mxu0 %v1676_v51 }
 0x7a5   : > { %1534 = vmatprep.subr.bf16.mxu0 %v1794_v49  ;;  %v1031_v9 = vpack.c.bf16 %v1030_v7, %v1029_v6 }
 0x7a8   : > { %1535 = vmatpush3.bf16.msra.mxu0 %v1677_v52 }
 0x7a9   : > { %1536 = vmatprep.subr.bf16.mxu0 %v1794_v49 }
 0x7ac   : > { %1537 = vmatpush3.bf16.msra.mxu0 %v1678_v59 }
 0x7ad   : > { %1538 = vmatprep.subr.bf16.mxu0 %v1794_v49 }
 0x7b0   : > { %1539 = vmatpush3.bf16.msra.mxu0 %v1679_v0 }
 0x7b1   : > { %1540 = vmatprep.subr.bf16.mxu0 %v1794_v49 }
 0x7b4   : > { %1541 = vmatpush3.bf16.msra.mxu0 %v1680_v5 }
 0x7b5   : > { %1542 = vmatprep.subr.bf16.mxu0 %v1794_v49 }
 0x7b8   : > { %1543 = vmatpush3.bf16.msra.mxu0 %v1681_v8 }
 0x7bb   : > { %1545 = vmatmul.mubr.bf16.vlgmr.msra.gmra.mxu0 %v1031_v9 }
 0x87b   : > { %v1130_v10 = vpop.f32.mrf.mxu0 }
 0x87d   : > { %v1546_v11 = vpop.f32.mrf.mxu0 }
 0x87f   : > { %v1133_v12 = vpop.f32.mrf.mxu0 }
 0x880   : > { %v1139_v13 = vpack.c.bf16 %v1133_v12, %v1130_v10 }
 0x881   : > { %v1547_v14 = vpop.f32.mrf.mxu0 }
 0x882   : > { %1549 = vmatpush3.bf16.msra.mxu1 %v1139_v13 }
 0x885   : > { %1551 = vmatmul.mubr.msk.bf16.vlgmr.msra.gmra.mxu1 %vm1152_vm3, %v1682_v15 }
 0x945   : > { %v1190_v19 = vpop.f32.mrf.mxu1 }
 0x946   : > { %v1191_v20 = vadd.f32 %v1361_v18, %v1190_v19 }
 0x947   : > { %v1552_v21 = vpop.f32.mrf.mxu1 }
 0x948   : > { %v1200_v22 = vsel %vm1199_vm4, %v1191_v20, -inf }
 0x949   : > { %1202 = vmax.xlane.f32.xlu0 %v1200_v22  ;;  %v1193_v23 = vpop.f32.mrf.mxu1 }
 0x94a   : > { %v1194_v24 = vadd.f32 %v1361_v18, %v1193_v23 }
 0x94b   : > { %v1553_v25 = vpop.f32.mrf.mxu1 }
 0x94c   : > { %v1201_v26 = vsel %vm1199_vm4, %v1194_v24, -inf }
 0x94d   : > { %1204 = vmax.xlane.f32.xlu0 %v1201_v26 }
 0x9d2   : > { %v1203_v27 = vpop.xlane.xlu0 %1202 }
 0x9d3   : > { %v1206_v28 = vsub.f32 %v1191_v20, %v1203_v27 }
 0x9d5   : > { %v1208_v29 = vmul.f32 1.442695, %v1206_v28 }
 0x9d6   : > { %v1205_v30 = vpop.xlane.xlu0 %1204 }
 0x9d7   : > { %1683 = vpow2.f32 %v1208_v29  ;;  %v1207_v31 = vsub.f32 %v1194_v24, %v1205_v30 }
 0x9d9   : > { %v1210_v32 = vmul.f32 1.442695, %v1207_v31 }
 0x9db   : > { %1685 = vpow2.f32 %v1210_v32 }
 0x9e4   : > { %v1684_v33 = vpop.eup %1683 }
 0x9e5   : > { %v1212_v34 = vsel %vm1199_vm4, %v1684_v33, 0.0 }
 0x9e6   : > { %1214 = vadd.xlane.f32.xlu1 %v1212_v34 }
 0x9e8   : > { %v1686_v35 = vpop.eup %1685 }
 0x9e9   : > { %v1213_v36 = vsel %vm1199_vm4, %v1686_v35, 0.0 }
 0x9ea   : > { %1216 = vadd.xlane.f32.xlu1 %v1213_v36 }
 0xa6f   : > { %v1215_v37 = vpop.xlane.xlu1 %1214 }
 0xa70   : > { %1687 = vrcp.f32 %v1215_v37 }
 0xa73   : > { %v1217_v38 = vpop.xlane.xlu1 %1216 }
 0xa74   : > { %1689 = vrcp.f32 %v1217_v38 }
 0xa7d   : > { %v1688_v39 = vpop.eup %1687 }
 0xa7e   : > { %v1219_v40 = vmul.f32 %v1688_v39, %v1212_v34 }
 0xa80   : > { %1222 = vst [vmem:[#allocation7] sm:$0xff] %v1219_v40 }
 0xa81   : > { %v1690_v41 = vpop.eup %1689 }
 0xa82   : > { %v1221_v42 = vmul.f32 %v1690_v41, %v1213_v36 }
 0xa84   : > { %1223 = vst [vmem:[#allocation7 + $0x8] sm:$0xff] %v1221_v42 }
 0xa85 PF: > { %p1565_p5 = scmp.eq.s32.totalorder %s1843_s19, 4  ;;  %s1796_s29 = smov [#allocation7]  }
 0xa86   : > { %s1230_s5 = sshll.u32 %s1796_s29, 4  ;;  %s1231_s5 = int_to_ptr.vmem [resolvable:$true] %s1230_s5 }
 0xa87   : > { %s1719_s9 = scalar_lea.vmem %s1231_s5, 256  ;;  %p1726_p11 = scmp.lt.s32.totalorder %s1231_s5, %s1231_s5 }
 0xa88   : > { %p1720_p6 = scmp.ne.s32.totalorder %s1231_s5, %s1719_s9  ;;  %p1727_p13 = scmp.lt.s32.totalorder %s1719_s9, %s1719_s9 }
 0xa8a   : > { %p1721_p10 = pnand %p1720_p6, %p1565_p5  ;;  %p1728_p0 = por %p1727_p13, %p1726_p11 }
 0xa8c   : > { %p1722_p12 = pneg %p1721_p10 }
 0xa8e   : > { %p1729_p7 = pnand %p1728_p0, %p1722_p12 }
 0xa90   : > { %1732 = shalt.err (!%p1729_p7)
}
 0xa91   : > { %s1797_s30 = smov 128   ;;  %s1798_s6 = smov 8  }
 0xa92   : > { %1557 = dma.vmem_to_hbm [thread:$0]  (%p1565_p5), %s1231_s5, 256, %s2020_s4, [#allocation6], %s1797_s30, %s1797_s30, %s1798_s6  }
 0xa93   : > { %1764 = dma.done.wait (%p1565_p5), [#allocation6], 256  }
 0xa94   : > { %1766 = vsyncadd (%p1565_p5), [#allocation6], 4294967040 }
 0xa95 PF: > { %p15_p9 = scmp.ge.s32.totalorder %s1846_s20, 7   ;;  %s2026_s15 = smov %s1773_s16 }
 0xa96   : > { %s2027_s16 = smov %s1777_s17  ;;  %s2028_s17 = smov %s1856_s23 }
 0xa97   : > { %s2029_s18 = smov %s1846_s20  ;;  %17 = sbr.rel (!%p15_p9) target bundleno = 4 (0x4), region = 100 }
 0xa9c   :  { %1246 = vsyncpa [#allocation5], 1 }
 0xa9d   :  { %1248 = vsyncpa [#allocation5 + $0x1], 1 }
 0xa9e   :  { %1249 = vsyncpa [#allocation6], 1 }
 0xa9f   :  { %1251 = vsyncpa [#allocation6 + $0x1], 1 }

</bundles_post_ra>
